<compile_context>
chip_gen: v6e
topology: v6e:2x2x1
jax: 0.10.0
libtpu: 0.0.40
codegen_flags: <defaults>
</compile_context>

<pallas_src>
import functools

import jax
import jax.numpy as jnp
from jax.experimental import pallas as pl
from jax.experimental.pallas import tpu as pltpu


# ----------------------------- helpers ---------------------------------------

def _choose_seq_tile(n, target):
    """Largest multiple-of-8 divisor of n that is <= target; falls back to n."""
    if n <= target:
        return n
    t = (min(target, n) // 8) * 8
    while t >= 8:
        if n % t == 0:
            return t
        t -= 8
    return n


# ----------------------------- tiled linear (matmul + bias) ------------------

def _linear_kernel(x_ref, w_ref, b_ref, o_ref):
    # x: [tm, K], w: [K, N], b: [1, N]  -> o: [tm, N]
    acc = jnp.dot(x_ref[...], w_ref[...], preferred_element_type=jnp.float32)
    o_ref[...] = (acc + b_ref[...].astype(jnp.float32)).astype(o_ref.dtype)


def pallas_linear(x2d, w, b, *, tile_m=512):
    """x2d: [M, K] @ w: [K, N] + b: [N], M-tiled Pallas matmul."""
    M, K = x2d.shape
    N = w.shape[1]
    b2d = b.reshape(1, N).astype(x2d.dtype)

    tm = min(tile_m, M)
    tm = max(8, ((tm + 7) // 8) * 8)
    Mp = ((M + tm - 1) // tm) * tm
    xp = x2d if Mp == M else jnp.pad(x2d, ((0, Mp - M), (0, 0)))

    out = pl.pallas_call(
        _linear_kernel,
        out_shape=jax.ShapeDtypeStruct((Mp, N), x2d.dtype),
        grid=(Mp // tm,),
        in_specs=[
            pl.BlockSpec((tm, K), lambda i: (i, 0)),
            pl.BlockSpec((K, N), lambda i: (0, 0)),
            pl.BlockSpec((1, N), lambda i: (0, 0)),
        ],
        out_specs=pl.BlockSpec((tm, N), lambda i: (i, 0)),
        compiler_params=pltpu.CompilerParams(
            dimension_semantics=("parallel",)),
    )(xp, w, b2d)
    return out[:M] if Mp != M else out


# ----------------------------- flash attention kernel ------------------------

def _flash_attn_kernel(q_ref, k_ref, v_ref, o_ref, m_sc, l_sc, acc_sc, *, scale):
    # q_ref: [nh, tq, hd], k_ref/v_ref: [nh, tk, hd], o_ref: [tq, nh*hd]
    nh, tq, hd = q_ref.shape
    ki = pl.program_id(2)

    @pl.when(ki == 0)
    def _init():
        m_sc[...] = jnp.full_like(m_sc, -jnp.inf)
        l_sc[...] = jnp.zeros_like(l_sc)
        acc_sc[...] = jnp.zeros_like(acc_sc)

    q = q_ref[...]
    k = k_ref[...]
    v = v_ref[...]

    # scores: [nh, tq, tk] (batched over heads, no explicit transpose of K)
    s = jnp.einsum("hqd,hkd->hqk", q, k,
                   preferred_element_type=jnp.float32) * scale

    m_prev = m_sc[...]                                         # [nh, tq, 1]
    m_new = jnp.maximum(m_prev, jnp.max(s, axis=-1, keepdims=True))
    alpha = jnp.exp(m_prev - m_new)                            # rescale factor
    p = jnp.exp(s - m_new)                                     # [nh, tq, tk]

    l_sc[...] = alpha * l_sc[...] + jnp.sum(p, axis=-1, keepdims=True)
    acc_sc[...] = alpha * acc_sc[...] + jnp.einsum(
        "hqk,hkd->hqd", p.astype(v.dtype), v,
        preferred_element_type=jnp.float32)
    m_sc[...] = m_new

    @pl.when(ki == pl.num_programs(2) - 1)
    def _finalize():
        out = acc_sc[...] / l_sc[...]                          # [nh, tq, hd]
        # lane-dense [tq, C] output slab; per-head static column writes
        for h in range(nh):
            o_ref[:, h * hd:(h + 1) * hd] = out[h].astype(o_ref.dtype)


def pallas_attention(q, k, v, scale, *, tq_target=256, tk_target=512):
    """q, k, v: [B, num_heads, N, head_dim] -> out: [B, N, C] (C = nh*hd)."""
    B, nh, N, hd = q.shape
    C = nh * hd
    tq = _choose_seq_tile(N, tq_target)
    tk = _choose_seq_tile(N, tk_target)

    kernel = functools.partial(_flash_attn_kernel, scale=scale)
    return pl.pallas_call(
        kernel,
        out_shape=jax.ShapeDtypeStruct((B, N, C), q.dtype),
        grid=(B, N // tq, N // tk),
        in_specs=[
            pl.BlockSpec((None, nh, tq, hd), lambda b, qi, ki: (b, 0, qi, 0)),
            pl.BlockSpec((None, nh, tk, hd), lambda b, qi, ki: (b, 0, ki, 0)),
            pl.BlockSpec((None, nh, tk, hd), lambda b, qi, ki: (b, 0, ki, 0)),
        ],
        out_specs=pl.BlockSpec((None, tq, C), lambda b, qi, ki: (b, qi, 0)),
        scratch_shapes=[
            pltpu.VMEM((nh, tq, 1), jnp.float32),   # running max m
            pltpu.VMEM((nh, tq, 1), jnp.float32),   # running denom l
            pltpu.VMEM((nh, tq, hd), jnp.float32),  # output accumulator
        ],
        compiler_params=pltpu.CompilerParams(
            dimension_semantics=("parallel", "parallel", "arbitrary")),
    )(q, k, v)


# ----------------------------- module forward (glue) -------------------------

def make_params(key, dim, qkv_bias=False):
    k1, k2, k3, k4 = jax.random.split(key, 4)
    std = 0.05
    params = {
        # stored in PyTorch nn.Linear layout: [out_features, in_features]
        "wq": jax.random.normal(k1, (dim, dim), jnp.float32) * std,
        "wkv": jax.random.normal(k2, (2 * dim, dim), jnp.float32) * std,
        "wproj": jax.random.normal(k3, (dim, dim), jnp.float32) * std,
        "bproj": jax.random.normal(k4, (dim,), jnp.float32) * std,
    }
    # qkv_bias=False in the reference default -> no q/kv bias
    return params


def attention_forward(x, params, num_heads):
    """x: [B, C, H, W] (NCHW) -> [B, C, H, W], sr_ratio=1 path."""
    B, C, H, W = x.shape
    N = H * W
    hd = C // num_heads
    scale = hd ** -0.5

    # [B, C, H, W] -> [B, N, C] -> [B*N, C]
    tokens = x.reshape(B, C, N).transpose(0, 2, 1).reshape(B * N, C)

    # fused q/kv projection: one matmul, weights concatenated to [C, 3C]
    w_qkv = jnp.concatenate([params["wq"], params["wkv"]], axis=0).T  # [C, 3C]
    zeros_3c = jnp.zeros((3 * C,), x.dtype)
    qkv = pallas_linear(tokens, w_qkv, zeros_3c)                      # [B*N, 3C]

    q = qkv[:, :C].reshape(B, N, num_heads, hd).transpose(0, 2, 1, 3)        # [B,h,N,hd]
    k = qkv[:, C:2 * C].reshape(B, N, num_heads, hd).transpose(0, 2, 1, 3)   # [B,h,N,hd]
    v = qkv[:, 2 * C:].reshape(B, N, num_heads, hd).transpose(0, 2, 1, 3)    # [B,h,N,hd]

    # flash attention; output already lane-dense [B, N, C]
    o = pallas_attention(q, k, v, scale).reshape(B * N, C)

    o = pallas_linear(o, params["wproj"].T, params["bproj"])          # [B*N, C]

    # [B*N, C] -> [B, N, C] -> [B, C, H, W]
    return o.reshape(B, N, C).transpose(0, 2, 1).reshape(B, C, H, W)


# ----------------------------- pure-JAX reference (sanity) -------------------

def reference_forward(x, params, num_heads):
    B, C, H, W = x.shape
    N = H * W
    hd = C // num_heads
    scale = hd ** -0.5
    t = x.reshape(B, C, N).transpose(0, 2, 1)                       # [B, N, C]
    q = t @ params["wq"].T
    kv = t @ params["wkv"].T
    q = q.reshape(B, N, num_heads, hd).transpose(0, 2, 1, 3)
    kv = kv.reshape(B, N, 2, num_heads, hd).transpose(2, 0, 3, 1, 4)
    k, v = kv[0], kv[1]
    attn = jnp.einsum("bhnd,bhmd->bhnm", q, k) * scale
    attn = jax.nn.softmax(attn, axis=-1)
    o = jnp.einsum("bhnm,bhmd->bhnd", attn, v)
    o = o.transpose(0, 2, 1, 3).reshape(B, N, C)
    o = o @ params["wproj"].T + params["bproj"]
    return o.transpose(0, 2, 1).reshape(B, C, H, W)


if __name__ == "__main__":
    key = jax.random.PRNGKey(0)
    kx, kp = jax.random.split(key)

    # N = 32*32 = 1024 -> exercises multi-step KV accumulation (tq=256, tk=512)
    B, dim, H, W = 2, 32, 32, 32
    num_heads = 4

    x = jax.random.normal(kx, (B, dim, H, W), jnp.float32)
    params = make_params(kp, dim)

    out = attention_forward(x, params, num_heads)
    out = jax.block_until_ready(out)

    ref = reference_forward(x, params, num_heads)
    assert out.shape == (B, dim, H, W)
    assert jnp.allclose(out, ref, atol=1e-3, rtol=1e-3), "mismatch vs JAX reference"

    print("KERNEL_OK")
</pallas_src>

<mosaic_0001>
module attributes {stable_mosaic.version = 11 : i64} {
  func.func @_linear_kernel(%arg0: i32, %arg1: memref<512x32xf32, #tpu.memory_space<vmem>>, %arg2: memref<32x96xf32, #tpu.memory_space<vmem>>, %arg3: memref<1x96xf32, #tpu.memory_space<vmem>>, %arg4: memref<512x96xf32, #tpu.memory_space<vmem>>) attributes {dimension_semantics = [#tpu.dimension_semantics<parallel>], iteration_bounds = array<i64: 4>, scalar_prefetch = 0 : i64, scratch_operands = 0 : i64, tpu.core_type = #tpu.core_type<tc>, window_params = [{transform_indices = @transform_0, window_bounds = array<i64: 512, 32>}, {pipeline_mode = #tpu.pipeline_mode<synchronous>, transform_indices = @transform_1, window_bounds = array<i64: 32, 96>}, {pipeline_mode = #tpu.pipeline_mode<synchronous>, transform_indices = @transform_2, window_bounds = array<i64: 1, 96>}, {transform_indices = @transform_3, window_bounds = array<i64: 512, 96>}]} {
    %c0 = arith.constant 0 : index
    %c0_0 = arith.constant 0 : index
    %0 = vector.load %arg1[%c0, %c0_0] : memref<512x32xf32, #tpu.memory_space<vmem>>, vector<512x32xf32>
    %c0_1 = arith.constant 0 : index
    %c0_2 = arith.constant 0 : index
    %1 = vector.load %arg2[%c0_1, %c0_2] : memref<32x96xf32, #tpu.memory_space<vmem>>, vector<32x96xf32>
    %cst = arith.constant dense<0.000000e+00> : vector<512x96xf32>
    %2 = tpu.matmul %0, %1, %cst {dimension_numbers = #tpu.dot_dimension_numbers<[1], [0], [0], [1], [0, 0, 1, 1], [], []>} : vector<512x32xf32>, vector<32x96xf32>, vector<512x96xf32> -> vector<512x96xf32>
    %c0_3 = arith.constant 0 : index
    %c0_4 = arith.constant 0 : index
    %3 = vector.load %arg3[%c0_3, %c0_4] : memref<1x96xf32, #tpu.memory_space<vmem>>, vector<1x96xf32>
    %4 = vector.broadcast %3 : vector<1x96xf32> to vector<512x96xf32>
    %5 = arith.addf %2, %4 : vector<512x96xf32>
    %c0_5 = arith.constant 0 : index
    %c0_6 = arith.constant 0 : index
    %6 = vector.load %arg4[%c0_5, %c0_6] : memref<512x96xf32, #tpu.memory_space<vmem>>, vector<512x96xf32>
    tpu.vector_store %arg4[%c0_5, %c0_6], %5 {strides = array<i32>} : memref<512x96xf32, #tpu.memory_space<vmem>>, vector<512x96xf32>,
    return
  }
  func.func @transform_0(%arg0: i32) -> (i32, i32) {
    %c0_i32 = arith.constant 0 : i32
    %c0_i32_0 = arith.constant 0 : i32
    return %arg0, %c0_i32 : i32, i32
  }
  func.func @transform_1(%arg0: i32) -> (i32, i32) {
    %c0_i32 = arith.constant 0 : i32
    %c0_i32_0 = arith.constant 0 : i32
    %c0_i32_1 = arith.constant 0 : i32
    return %c0_i32, %c0_i32_0 : i32, i32
  }
  func.func @transform_2(%arg0: i32) -> (i32, i32) {
    %c0_i32 = arith.constant 0 : i32
    %c0_i32_0 = arith.constant 0 : i32
    %c0_i32_1 = arith.constant 0 : i32
    return %c0_i32, %c0_i32_0 : i32, i32
  }
  func.func @transform_3(%arg0: i32) -> (i32, i32) {
    %c0_i32 = arith.constant 0 : i32
    %c0_i32_0 = arith.constant 0 : i32
    return %arg0, %c0_i32 : i32, i32
  }
}

</mosaic_0001>

<bundles_post_ra>
// kernel: tpu_custom_call.1
= control target key start
LH: loop header
LB: loop body
LE: loop exit
PB: predicated region body
PF: predicated region fallthrough
CT: control target
= control target key end

     0   :  { %s1240_s12 = smov 0   ;;  %s1605_s0 = inlined_call_operand.vmem [shape: f32[2048,32], index: 0, kind: input, shape index: {}]   ;;  %s1606_s1 = inlined_call_operand.vmem [shape: f32[32,96], index: 1, kind: input, shape index: {}]   ;;  %s1607_s2 = inlined_call_operand.vmem [shape: f32[1,96], index: 2, kind: input, shape index: {}]   ;;  %s1608_s3 = inlined_call_operand.vmem [shape: f32[2048,96], index: 3, kind: output, shape index: {}]  }
   0x1 LB: > { %s948_s13 = sadd.s32 4294967295, %s1218_s12   ;;  %p952_p0 = scmp.ge.s32.totalorder %s1218_s12, 1  ;;  %s1218_s12 = sphi %s1240_s12, %s13_s12  }
   0x2   : > { %p138_p1 = scmp.lt.s32.totalorder %s1218_s12, 5 }
   0x4   : > { %p139_p2 = pnand %p952_p0, %p138_p1 }
   0x5   : > { %s953_s18 = sshll.u32 (!%p139_p2), %s948_s13, 6 }
   0x6   : > { %142 = sbr.rel (%p139_p2) target bundleno = 279 (0x117), region = 32  ;;  %p163_p3 = scmp.lt.s32.totalorder (!%p139_p2), %s953_s18, 255 }
   0xb   : > { %v241_v0 = vld [vmem:[%s1606_s1 + $0x18] sm:$0xff]  ;;  %v240_v1 = vld [vmem:[%s1606_s1 + $0x10] sm:$0xff]  ;;  %v239_v2 = vld [vmem:[%s1606_s1 + $0x8] sm:$0xff]  ;;  %s1610_s18 = smov (!%p163_p3, %s953_s18), 255  ;;  %vm249_vm0 = vcmask 261120   ;;  %vm827_vm1 = vcmask 785408  }
   0xc   : > { %1092 = vmatprep.subr.mxu0 %v241_v0  ;;  %1196 = vmatprep.subr.mxu1 %v241_v0  ;;  %v238_v3 = vld [vmem:[%s1606_s1] sm:$0xff]  ;;  %s954_s23 = sshll.u32 %s1610_s18, 3 }
   0xd   : > { %1093 = vmatpush3.msra.mxu0 %v241_v0  ;;  %1200 = vmatpush3.msra.mxu1 %v241_v0  ;;  %s1268_s26 = scalar_lea.vmem %s1605_s0, %s954_s23  ;;  %s1408_s4 = scalar_lea.vmem %s1608_s3, %s954_s23 }
   0xe   : > { %1094 = vmatprep.subr.mxu0 %v240_v1  ;;  %1197 = vmatprep.subr.mxu1 %v240_v1  ;;  %v174_v4 = vld [vmem:[%s1268_s26] sm:$0xff]  ;;  %v175_v6 = vld [vmem:[%s1268_s26 + $0x8] sm:$0xff]  ;;  %v176_v8 = vld [vmem:[%s1268_s26 + $0x10] sm:$0xff] }
   0xf   : > { %1095 = vmatpush3.msra.mxu0 %v240_v1  ;;  %1201 = vmatpush3.msra.mxu1 %v240_v1  ;;  %v206_v5 = vld [vmem:[%s1268_s26 + $0x100] sm:$0xff]  ;;  %v207_v7 = vld [vmem:[%s1268_s26 + $0x108] sm:$0xff]  ;;  %v208_v9 = vld [vmem:[%s1268_s26 + $0x110] sm:$0xff] }
  0x10   : > { %1096 = vmatprep.subr.mxu0 %v239_v2  ;;  %1198 = vmatprep.subr.mxu1 %v239_v2  ;;  %v177_v10 = vld [vmem:[%s1268_s26 + $0x18] sm:$0xff]  ;;  %v178_v12 = vld [vmem:[%s1268_s26 + $0x20] sm:$0xff]  ;;  %v179_v14 = vld [vmem:[%s1268_s26 + $0x28] sm:$0xff] }
  0x11   : > { %1097 = vmatpush3.msra.mxu0 %v239_v2  ;;  %1202 = vmatpush3.msra.mxu1 %v239_v2  ;;  %v209_v11 = vld [vmem:[%s1268_s26 + $0x118] sm:$0xff]  ;;  %v210_v13 = vld [vmem:[%s1268_s26 + $0x120] sm:$0xff]  ;;  %v211_v15 = vld [vmem:[%s1268_s26 + $0x128] sm:$0xff] }
  0x12   : > { %1098 = vmatprep.subr.mxu0 %v238_v3  ;;  %1199 = vmatprep.subr.mxu1 %v238_v3  ;;  %v180_v16 = vld [vmem:[%s1268_s26 + $0x30] sm:$0xff]  ;;  %v181_v18 = vld [vmem:[%s1268_s26 + $0x38] sm:$0xff]  ;;  %v182_v20 = vld [vmem:[%s1268_s26 + $0x40] sm:$0xff] }
  0x13   : > { %1099 = vmatpush3.msra.mxu0 %v238_v3  ;;  %1203 = vmatpush3.msra.mxu1 %v238_v3  ;;  %v212_v17 = vld [vmem:[%s1268_s26 + $0x130] sm:$0xff]  ;;  %v213_v19 = vld [vmem:[%s1268_s26 + $0x138] sm:$0xff]  ;;  %v214_v21 = vld [vmem:[%s1268_s26 + $0x140] sm:$0xff] }
  0x14   : > { %1100 = vmatprep.mubr.msk.f32.mxu0 %vm249_vm0, %v174_v4  ;;  %1148 = vmatprep.mubr.msk.f32.mxu1 %vm249_vm0, %v206_v5  ;;  %v183_v22 = vld [vmem:[%s1268_s26 + $0x48] sm:$0xff]  ;;  %v184_v24 = vld [vmem:[%s1268_s26 + $0x50] sm:$0xff]  ;;  %v185_v26 = vld [vmem:[%s1268_s26 + $0x58] sm:$0xff] }
  0x15   : > { %1101 = vmatmul.mubr.msk.f32.vlgmr.msra.gmra.mxu0 %vm249_vm0, %v175_v6  ;;  %1149 = vmatmul.mubr.msk.f32.vlgmr.msra.gmra.mxu1 %vm249_vm0, %v207_v7  ;;  %v215_v23 = vld [vmem:[%s1268_s26 + $0x148] sm:$0xff]  ;;  %v216_v25 = vld [vmem:[%s1268_s26 + $0x150] sm:$0xff]  ;;  %v217_v27 = vld [vmem:[%s1268_s26 + $0x158] sm:$0xff] }
  0x16   : > { %1103 = vmatprep.mubr.msk.f32.mxu0 %vm249_vm0, %v176_v8  ;;  %1151 = vmatprep.mubr.msk.f32.mxu1 %vm249_vm0, %v208_v9  ;;  %v186_v28 = vld [vmem:[%s1268_s26 + $0x60] sm:$0xff]  ;;  %v187_v30 = vld [vmem:[%s1268_s26 + $0x68] sm:$0xff]  ;;  %v188_v32 = vld [vmem:[%s1268_s26 + $0x70] sm:$0xff] }
  0x17   : > { %v218_v29 = vld [vmem:[%s1268_s26 + $0x160] sm:$0xff]  ;;  %v219_v31 = vld [vmem:[%s1268_s26 + $0x168] sm:$0xff]  ;;  %v220_v33 = vld [vmem:[%s1268_s26 + $0x170] sm:$0xff] }
  0x18   : > { %v189_v34 = vld [vmem:[%s1268_s26 + $0x78] sm:$0xff]  ;;  %v190_v36 = vld [vmem:[%s1268_s26 + $0x80] sm:$0xff]  ;;  %v191_v38 = vld [vmem:[%s1268_s26 + $0x88] sm:$0xff] }
  0x19   : > { %1104 = vmatmul.mubr.msk.f32.gmra.mxu0 %vm249_vm0, %v177_v10  ;;  %1152 = vmatmul.mubr.msk.f32.gmra.mxu1 %vm249_vm0, %v209_v11  ;;  %v221_v35 = vld [vmem:[%s1268_s26 + $0x178] sm:$0xff]  ;;  %v222_v37 = vld [vmem:[%s1268_s26 + $0x180] sm:$0xff]  ;;  %v223_v39 = vld [vmem:[%s1268_s26 + $0x188] sm:$0xff] }
  0x1a   : > { %1106 = vmatprep.mubr.msk.f32.mxu0 %vm249_vm0, %v178_v12  ;;  %1154 = vmatprep.mubr.msk.f32.mxu1 %vm249_vm0, %v210_v13  ;;  %v192_v40 = vld [vmem:[%s1268_s26 + $0x90] sm:$0xff]  ;;  %v193_v42 = vld [vmem:[%s1268_s26 + $0x98] sm:$0xff]  ;;  %v194_v44 = vld [vmem:[%s1268_s26 + $0xa0] sm:$0xff] }
  0x1b   : > { %v224_v41 = vld [vmem:[%s1268_s26 + $0x190] sm:$0xff]  ;;  %v225_v43 = vld [vmem:[%s1268_s26 + $0x198] sm:$0xff]  ;;  %v226_v45 = vld [vmem:[%s1268_s26 + $0x1a0] sm:$0xff] }
  0x1c   : > { %v195_v46 = vld [vmem:[%s1268_s26 + $0xa8] sm:$0xff]  ;;  %v196_v48 = vld [vmem:[%s1268_s26 + $0xb0] sm:$0xff]  ;;  %v197_v50 = vld [vmem:[%s1268_s26 + $0xb8] sm:$0xff] }
  0x1d   : > { %1107 = vmatmul.mubr.msk.f32.gmra.mxu0 %vm249_vm0, %v179_v14  ;;  %1155 = vmatmul.mubr.msk.f32.gmra.mxu1 %vm249_vm0, %v211_v15  ;;  %v227_v47 = vld [vmem:[%s1268_s26 + $0x1a8] sm:$0xff]  ;;  %v228_v49 = vld [vmem:[%s1268_s26 + $0x1b0] sm:$0xff]  ;;  %v229_v51 = vld [vmem:[%s1268_s26 + $0x1b8] sm:$0xff] }
  0x1e   : > { %1109 = vmatprep.mubr.msk.f32.mxu0 %vm249_vm0, %v180_v16  ;;  %1157 = vmatprep.mubr.msk.f32.mxu1 %vm249_vm0, %v212_v17  ;;  %v198_v52 = vld [vmem:[%s1268_s26 + $0xc0] sm:$0xff]  ;;  %v199_v54 = vld [vmem:[%s1268_s26 + $0xc8] sm:$0xff]  ;;  %v200_v56 = vld [vmem:[%s1268_s26 + $0xd0] sm:$0xff] }
  0x1f   : > { %v230_v53 = vld [vmem:[%s1268_s26 + $0x1c0] sm:$0xff]  ;;  %v231_v55 = vld [vmem:[%s1268_s26 + $0x1c8] sm:$0xff]  ;;  %v232_v57 = vld [vmem:[%s1268_s26 + $0x1d0] sm:$0xff] }
  0x20   : > { %v201_v58 = vld [vmem:[%s1268_s26 + $0xd8] sm:$0xff]  ;;  %v202_v60 = vld [vmem:[%s1268_s26 + $0xe0] sm:$0xff]  ;;  %v203_v62 = vld [vmem:[%s1268_s26 + $0xe8] sm:$0xff] }
  0x21   : > { %1110 = vmatmul.mubr.msk.f32.gmra.mxu0 %vm249_vm0, %v181_v18  ;;  %1158 = vmatmul.mubr.msk.f32.gmra.mxu1 %vm249_vm0, %v213_v19  ;;  %v233_v59 = vld [vmem:[%s1268_s26 + $0x1d8] sm:$0xff]  ;;  %v234_v61 = vld [vmem:[%s1268_s26 + $0x1e0] sm:$0xff]  ;;  %v235_v63 = vld [vmem:[%s1268_s26 + $0x1e8] sm:$0xff] }
  0x22   : > { %1112 = vmatprep.mubr.msk.f32.mxu0 %vm249_vm0, %v182_v20  ;;  %1160 = vmatprep.mubr.msk.f32.mxu1 %vm249_vm0, %v214_v21  ;;  %v204_v0 = vld [vmem:[%s1268_s26 + $0xf0] sm:$0xff]  ;;  %v205_v2 = vld [vmem:[%s1268_s26 + $0xf8] sm:$0xff]  ;;  %v1401_v4 = vld [vmem:[%s1607_s2] ss:$0 sm:$0xff] }
  0x23   : > { %v236_v1 = vld [vmem:[%s1268_s26 + $0x1f0] sm:$0xff]  ;;  %v237_v3 = vld [vmem:[%s1268_s26 + $0x1f8] sm:$0xff] }
  0x25   : > { %1113 = vmatmul.mubr.msk.f32.gmra.mxu0 %vm249_vm0, %v183_v22  ;;  %1161 = vmatmul.mubr.msk.f32.gmra.mxu1 %vm249_vm0, %v215_v23 }
  0x26   : > { %1115 = vmatprep.mubr.msk.f32.mxu0 %vm249_vm0, %v184_v24  ;;  %1163 = vmatprep.mubr.msk.f32.mxu1 %vm249_vm0, %v216_v25 }
  0x29   : > { %1116 = vmatmul.mubr.msk.f32.gmra.mxu0 %vm249_vm0, %v185_v26  ;;  %1164 = vmatmul.mubr.msk.f32.gmra.mxu1 %vm249_vm0, %v217_v27 }
  0x2a   : > { %1118 = vmatprep.mubr.msk.f32.mxu0 %vm249_vm0, %v186_v28  ;;  %1166 = vmatprep.mubr.msk.f32.mxu1 %vm249_vm0, %v218_v29 }
  0x2d   : > { %1119 = vmatmul.mubr.msk.f32.gmra.mxu0 %vm249_vm0, %v187_v30  ;;  %1167 = vmatmul.mubr.msk.f32.gmra.mxu1 %vm249_vm0, %v219_v31 }
  0x2e   : > { %1121 = vmatprep.mubr.msk.f32.mxu0 %vm249_vm0, %v188_v32  ;;  %1169 = vmatprep.mubr.msk.f32.mxu1 %vm249_vm0, %v220_v33 }
  0x31   : > { %1122 = vmatmul.mubr.msk.f32.gmra.mxu0 %vm249_vm0, %v189_v34  ;;  %1170 = vmatmul.mubr.msk.f32.gmra.mxu1 %vm249_vm0, %v221_v35 }
  0x32   : > { %1124 = vmatprep.mubr.msk.f32.mxu0 %vm249_vm0, %v190_v36  ;;  %1172 = vmatprep.mubr.msk.f32.mxu1 %vm249_vm0, %v222_v37 }
  0x35   : > { %1125 = vmatmul.mubr.msk.f32.gmra.mxu0 %vm249_vm0, %v191_v38  ;;  %1173 = vmatmul.mubr.msk.f32.gmra.mxu1 %vm249_vm0, %v223_v39 }
  0x36   : > { %1127 = vmatprep.mubr.msk.f32.mxu0 %vm249_vm0, %v192_v40  ;;  %1175 = vmatprep.mubr.msk.f32.mxu1 %vm249_vm0, %v224_v41 }
  0x39   : > { %1128 = vmatmul.mubr.msk.f32.gmra.mxu0 %vm249_vm0, %v193_v42  ;;  %1176 = vmatmul.mubr.msk.f32.gmra.mxu1 %vm249_vm0, %v225_v43 }
  0x3a   : > { %1130 = vmatprep.mubr.msk.f32.mxu0 %vm249_vm0, %v194_v44  ;;  %1178 = vmatprep.mubr.msk.f32.mxu1 %vm249_vm0, %v226_v45 }
  0x3d   : > { %1131 = vmatmul.mubr.msk.f32.gmra.mxu0 %vm249_vm0, %v195_v46  ;;  %1179 = vmatmul.mubr.msk.f32.gmra.mxu1 %vm249_vm0, %v227_v47 }
  0x3e   : > { %1133 = vmatprep.mubr.msk.f32.mxu0 %vm249_vm0, %v196_v48  ;;  %1181 = vmatprep.mubr.msk.f32.mxu1 %vm249_vm0, %v228_v49 }
  0x41   : > { %1134 = vmatmul.mubr.msk.f32.gmra.mxu0 %vm249_vm0, %v197_v50  ;;  %1182 = vmatmul.mubr.msk.f32.gmra.mxu1 %vm249_vm0, %v229_v51 }
  0x42   : > { %1136 = vmatprep.mubr.msk.f32.mxu0 %vm249_vm0, %v198_v52  ;;  %1184 = vmatprep.mubr.msk.f32.mxu1 %vm249_vm0, %v230_v53 }
  0x45   : > { %1137 = vmatmul.mubr.msk.f32.gmra.mxu0 %vm249_vm0, %v199_v54  ;;  %1185 = vmatmul.mubr.msk.f32.gmra.mxu1 %vm249_vm0, %v231_v55 }
  0x46   : > { %1139 = vmatprep.mubr.msk.f32.mxu0 %vm249_vm0, %v200_v56  ;;  %1187 = vmatprep.mubr.msk.f32.mxu1 %vm249_vm0, %v232_v57 }
  0x49   : > { %1140 = vmatmul.mubr.msk.f32.gmra.mxu0 %vm249_vm0, %v201_v58  ;;  %1188 = vmatmul.mubr.msk.f32.gmra.mxu1 %vm249_vm0, %v233_v59 }
  0x4a   : > { %1142 = vmatprep.mubr.msk.f32.mxu0 %vm249_vm0, %v202_v60  ;;  %1190 = vmatprep.mubr.msk.f32.mxu1 %vm249_vm0, %v234_v61 }
  0x4d   : > { %1143 = vmatmul.mubr.msk.f32.gmra.mxu0 %vm249_vm0, %v203_v62  ;;  %1191 = vmatmul.mubr.msk.f32.gmra.mxu1 %vm249_vm0, %v235_v63 }
  0x4e   : > { %1145 = vmatprep.mubr.msk.f32.mxu0 %vm249_vm0, %v204_v0  ;;  %1193 = vmatprep.mubr.msk.f32.mxu1 %vm249_vm0, %v236_v1 }
  0x51   : > { %1146 = vmatmul.mubr.msk.f32.gmra.mxu0 %vm249_vm0, %v205_v2  ;;  %1194 = vmatmul.mubr.msk.f32.gmra.mxu1 %vm249_vm0, %v237_v3 }
  0xd5   : > { %v1102_v5 = vpop.f32.mrf.mxu0  ;;  %v1150_v6 = vpop.f32.mrf.mxu1 }
  0xd6   : > { %v514_v7 = vadd.f32 %v1102_v5, %v1401_v4  ;;  %v674_v8 = vadd.f32 %v1150_v6, %v1401_v4 }
  0xd7   : > { %v508_v9 = vpop.f32.mrf.mxu0  ;;  %v668_v10 = vpop.f32.mrf.mxu1 }
  0xd8   : > { %829 = vst.msk [vmem:[%s1408_s4 + $0x8] sm:$0xff] %vm827_vm1, %v514_v7  ;;  %861 = vst.msk [vmem:[%s1408_s4 + $0x108] sm:$0xff] %vm827_vm1, %v674_v8  ;;  %v509_v11 = vadd.f32 %v1401_v4, %v508_v9  ;;  %v669_v12 = vadd.f32 %v1401_v4, %v668_v10 }
  0xd9   : > { %v1105_v13 = vpop.f32.mrf.mxu0  ;;  %v1153_v14 = vpop.f32.mrf.mxu1 }
  0xda   : > { %828 = vst.msk [vmem:[%s1408_s4] sm:$0xff] %vm827_vm1, %v509_v11  ;;  %860 = vst.msk [vmem:[%s1408_s4 + $0x100] sm:$0xff] %vm827_vm1, %v669_v12  ;;  %v524_v15 = vadd.f32 %v1105_v13, %v1401_v4  ;;  %v684_v16 = vadd.f32 %v1153_v14, %v1401_v4 }
  0xdb   : > { %v518_v17 = vpop.f32.mrf.mxu0  ;;  %v678_v18 = vpop.f32.mrf.mxu1 }
  0xdc   : > { %831 = vst.msk [vmem:[%s1408_s4 + $0x18] sm:$0xff] %vm827_vm1, %v524_v15  ;;  %863 = vst.msk [vmem:[%s1408_s4 + $0x118] sm:$0xff] %vm827_vm1, %v684_v16  ;;  %v519_v19 = vadd.f32 %v1401_v4, %v518_v17  ;;  %v679_v20 = vadd.f32 %v1401_v4, %v678_v18 }
  0xdd   : > { %v1108_v21 = vpop.f32.mrf.mxu0  ;;  %v1156_v22 = vpop.f32.mrf.mxu1 }
  0xde   : > { %830 = vst.msk [vmem:[%s1408_s4 + $0x10] sm:$0xff] %vm827_vm1, %v519_v19  ;;  %862 = vst.msk [vmem:[%s1408_s4 + $0x110] sm:$0xff] %vm827_vm1, %v679_v20  ;;  %v534_v23 = vadd.f32 %v1108_v21, %v1401_v4  ;;  %v694_v24 = vadd.f32 %v1156_v22, %v1401_v4 }
  0xdf   : > { %v528_v25 = vpop.f32.mrf.mxu0  ;;  %v688_v26 = vpop.f32.mrf.mxu1 }
  0xe0   : > { %833 = vst.msk [vmem:[%s1408_s4 + $0x28] sm:$0xff] %vm827_vm1, %v534_v23  ;;  %865 = vst.msk [vmem:[%s1408_s4 + $0x128] sm:$0xff] %vm827_vm1, %v694_v24  ;;  %v529_v27 = vadd.f32 %v1401_v4, %v528_v25  ;;  %v689_v28 = vadd.f32 %v1401_v4, %v688_v26 }
  0xe1   : > { %v1111_v29 = vpop.f32.mrf.mxu0  ;;  %v1159_v30 = vpop.f32.mrf.mxu1 }
  0xe2   : > { %832 = vst.msk [vmem:[%s1408_s4 + $0x20] sm:$0xff] %vm827_vm1, %v529_v27  ;;  %864 = vst.msk [vmem:[%s1408_s4 + $0x120] sm:$0xff] %vm827_vm1, %v689_v28  ;;  %v544_v31 = vadd.f32 %v1111_v29, %v1401_v4  ;;  %v704_v32 = vadd.f32 %v1159_v30, %v1401_v4 }
  0xe3   : > { %v538_v33 = vpop.f32.mrf.mxu0  ;;  %v698_v34 = vpop.f32.mrf.mxu1 }
  0xe4   : > { %835 = vst.msk [vmem:[%s1408_s4 + $0x38] sm:$0xff] %vm827_vm1, %v544_v31  ;;  %867 = vst.msk [vmem:[%s1408_s4 + $0x138] sm:$0xff] %vm827_vm1, %v704_v32  ;;  %v539_v35 = vadd.f32 %v1401_v4, %v538_v33  ;;  %v699_v36 = vadd.f32 %v1401_v4, %v698_v34 }
  0xe5   : > { %v1114_v37 = vpop.f32.mrf.mxu0  ;;  %v1162_v38 = vpop.f32.mrf.mxu1 }
  0xe6   : > { %834 = vst.msk [vmem:[%s1408_s4 + $0x30] sm:$0xff] %vm827_vm1, %v539_v35  ;;  %866 = vst.msk [vmem:[%s1408_s4 + $0x130] sm:$0xff] %vm827_vm1, %v699_v36  ;;  %v554_v39 = vadd.f32 %v1114_v37, %v1401_v4  ;;  %v714_v40 = vadd.f32 %v1162_v38, %v1401_v4 }
  0xe7   : > { %v548_v41 = vpop.f32.mrf.mxu0  ;;  %v708_v42 = vpop.f32.mrf.mxu1 }
  0xe8   : > { %837 = vst.msk [vmem:[%s1408_s4 + $0x48] sm:$0xff] %vm827_vm1, %v554_v39  ;;  %869 = vst.msk [vmem:[%s1408_s4 + $0x148] sm:$0xff] %vm827_vm1, %v714_v40  ;;  %v549_v43 = vadd.f32 %v1401_v4, %v548_v41  ;;  %v709_v44 = vadd.f32 %v1401_v4, %v708_v42 }
  0xe9   : > { %v1117_v45 = vpop.f32.mrf.mxu0  ;;  %v1165_v46 = vpop.f32.mrf.mxu1 }
  0xea   : > { %836 = vst.msk [vmem:[%s1408_s4 + $0x40] sm:$0xff] %vm827_vm1, %v549_v43  ;;  %868 = vst.msk [vmem:[%s1408_s4 + $0x140] sm:$0xff] %vm827_vm1, %v709_v44  ;;  %v564_v47 = vadd.f32 %v1117_v45, %v1401_v4  ;;  %v724_v48 = vadd.f32 %v1165_v46, %v1401_v4 }
  0xeb   : > { %v558_v49 = vpop.f32.mrf.mxu0  ;;  %v718_v50 = vpop.f32.mrf.mxu1 }
  0xec   : > { %839 = vst.msk [vmem:[%s1408_s4 + $0x58] sm:$0xff] %vm827_vm1, %v564_v47  ;;  %871 = vst.msk [vmem:[%s1408_s4 + $0x158] sm:$0xff] %vm827_vm1, %v724_v48  ;;  %v559_v51 = vadd.f32 %v1401_v4, %v558_v49  ;;  %v719_v52 = vadd.f32 %v1401_v4, %v718_v50 }
  0xed   : > { %v1120_v53 = vpop.f32.mrf.mxu0  ;;  %v1168_v54 = vpop.f32.mrf.mxu1 }
  0xee   : > { %838 = vst.msk [vmem:[%s1408_s4 + $0x50] sm:$0xff] %vm827_vm1, %v559_v51  ;;  %870 = vst.msk [vmem:[%s1408_s4 + $0x150] sm:$0xff] %vm827_vm1, %v719_v52  ;;  %v574_v55 = vadd.f32 %v1120_v53, %v1401_v4  ;;  %v734_v56 = vadd.f32 %v1168_v54, %v1401_v4 }
  0xef   : > { %v568_v57 = vpop.f32.mrf.mxu0  ;;  %v728_v58 = vpop.f32.mrf.mxu1 }
  0xf0   : > { %841 = vst.msk [vmem:[%s1408_s4 + $0x68] sm:$0xff] %vm827_vm1, %v574_v55  ;;  %873 = vst.msk [vmem:[%s1408_s4 + $0x168] sm:$0xff] %vm827_vm1, %v734_v56  ;;  %v569_v59 = vadd.f32 %v1401_v4, %v568_v57  ;;  %v729_v60 = vadd.f32 %v1401_v4, %v728_v58 }
  0xf1   : > { %v1123_v61 = vpop.f32.mrf.mxu0  ;;  %v1171_v62 = vpop.f32.mrf.mxu1 }
  0xf2   : > { %840 = vst.msk [vmem:[%s1408_s4 + $0x60] sm:$0xff] %vm827_vm1, %v569_v59  ;;  %872 = vst.msk [vmem:[%s1408_s4 + $0x160] sm:$0xff] %vm827_vm1, %v729_v60  ;;  %v584_v63 = vadd.f32 %v1123_v61, %v1401_v4  ;;  %v744_v0 = vadd.f32 %v1171_v62, %v1401_v4 }
  0xf3   : > { %v578_v1 = vpop.f32.mrf.mxu0  ;;  %v738_v2 = vpop.f32.mrf.mxu1 }
  0xf4   : > { %843 = vst.msk [vmem:[%s1408_s4 + $0x78] sm:$0xff] %vm827_vm1, %v584_v63  ;;  %875 = vst.msk [vmem:[%s1408_s4 + $0x178] sm:$0xff] %vm827_vm1, %v744_v0  ;;  %v579_v3 = vadd.f32 %v1401_v4, %v578_v1  ;;  %v739_v5 = vadd.f32 %v1401_v4, %v738_v2 }
  0xf5   : > { %v1126_v6 = vpop.f32.mrf.mxu0  ;;  %v1174_v7 = vpop.f32.mrf.mxu1 }
  0xf6   : > { %842 = vst.msk [vmem:[%s1408_s4 + $0x70] sm:$0xff] %vm827_vm1, %v579_v3  ;;  %874 = vst.msk [vmem:[%s1408_s4 + $0x170] sm:$0xff] %vm827_vm1, %v739_v5  ;;  %v594_v8 = vadd.f32 %v1126_v6, %v1401_v4  ;;  %v754_v9 = vadd.f32 %v1174_v7, %v1401_v4 }
  0xf7   : > { %v588_v10 = vpop.f32.mrf.mxu0  ;;  %v748_v11 = vpop.f32.mrf.mxu1 }
  0xf8   : > { %845 = vst.msk [vmem:[%s1408_s4 + $0x88] sm:$0xff] %vm827_vm1, %v594_v8  ;;  %877 = vst.msk [vmem:[%s1408_s4 + $0x188] sm:$0xff] %vm827_vm1, %v754_v9  ;;  %v589_v12 = vadd.f32 %v1401_v4, %v588_v10  ;;  %v749_v13 = vadd.f32 %v1401_v4, %v748_v11 }
  0xf9   : > { %v1129_v14 = vpop.f32.mrf.mxu0  ;;  %v1177_v15 = vpop.f32.mrf.mxu1 }
  0xfa   : > { %844 = vst.msk [vmem:[%s1408_s4 + $0x80] sm:$0xff] %vm827_vm1, %v589_v12  ;;  %876 = vst.msk [vmem:[%s1408_s4 + $0x180] sm:$0xff] %vm827_vm1, %v749_v13  ;;  %v604_v16 = vadd.f32 %v1129_v14, %v1401_v4  ;;  %v764_v17 = vadd.f32 %v1177_v15, %v1401_v4 }
  0xfb   : > { %v598_v18 = vpop.f32.mrf.mxu0  ;;  %v758_v19 = vpop.f32.mrf.mxu1 }
  0xfc   : > { %847 = vst.msk [vmem:[%s1408_s4 + $0x98] sm:$0xff] %vm827_vm1, %v604_v16  ;;  %879 = vst.msk [vmem:[%s1408_s4 + $0x198] sm:$0xff] %vm827_vm1, %v764_v17  ;;  %v599_v20 = vadd.f32 %v1401_v4, %v598_v18  ;;  %v759_v21 = vadd.f32 %v1401_v4, %v758_v19 }
  0xfd   : > { %v1132_v22 = vpop.f32.mrf.mxu0  ;;  %v1180_v23 = vpop.f32.mrf.mxu1 }
  0xfe   : > { %846 = vst.msk [vmem:[%s1408_s4 + $0x90] sm:$0xff] %vm827_vm1, %v599_v20  ;;  %878 = vst.msk [vmem:[%s1408_s4 + $0x190] sm:$0xff] %vm827_vm1, %v759_v21  ;;  %v614_v24 = vadd.f32 %v1132_v22, %v1401_v4  ;;  %v774_v25 = vadd.f32 %v1180_v23, %v1401_v4 }
  0xff   : > { %v608_v26 = vpop.f32.mrf.mxu0  ;;  %v768_v27 = vpop.f32.mrf.mxu1 }
 0x100   : > { %849 = vst.msk [vmem:[%s1408_s4 + $0xa8] sm:$0xff] %vm827_vm1, %v614_v24  ;;  %881 = vst.msk [vmem:[%s1408_s4 + $0x1a8] sm:$0xff] %vm827_vm1, %v774_v25  ;;  %v609_v28 = vadd.f32 %v1401_v4, %v608_v26  ;;  %v769_v29 = vadd.f32 %v1401_v4, %v768_v27 }
 0x101   : > { %v1135_v30 = vpop.f32.mrf.mxu0  ;;  %v1183_v31 = vpop.f32.mrf.mxu1 }
 0x102   : > { %848 = vst.msk [vmem:[%s1408_s4 + $0xa0] sm:$0xff] %vm827_vm1, %v609_v28  ;;  %880 = vst.msk [vmem:[%s1408_s4 + $0x1a0] sm:$0xff] %vm827_vm1, %v769_v29  ;;  %v624_v32 = vadd.f32 %v1135_v30, %v1401_v4  ;;  %v784_v33 = vadd.f32 %v1183_v31, %v1401_v4 }
 0x103   : > { %v618_v34 = vpop.f32.mrf.mxu0  ;;  %v778_v35 = vpop.f32.mrf.mxu1 }
 0x104   : > { %851 = vst.msk [vmem:[%s1408_s4 + $0xb8] sm:$0xff] %vm827_vm1, %v624_v32  ;;  %883 = vst.msk [vmem:[%s1408_s4 + $0x1b8] sm:$0xff] %vm827_vm1, %v784_v33  ;;  %v619_v36 = vadd.f32 %v1401_v4, %v618_v34  ;;  %v779_v37 = vadd.f32 %v1401_v4, %v778_v35 }
 0x105   : > { %v1138_v38 = vpop.f32.mrf.mxu0  ;;  %v1186_v39 = vpop.f32.mrf.mxu1 }
 0x106   : > { %850 = vst.msk [vmem:[%s1408_s4 + $0xb0] sm:$0xff] %vm827_vm1, %v619_v36  ;;  %882 = vst.msk [vmem:[%s1408_s4 + $0x1b0] sm:$0xff] %vm827_vm1, %v779_v37  ;;  %v634_v40 = vadd.f32 %v1138_v38, %v1401_v4  ;;  %v794_v41 = vadd.f32 %v1186_v39, %v1401_v4 }
 0x107   : > { %v628_v42 = vpop.f32.mrf.mxu0  ;;  %v788_v43 = vpop.f32.mrf.mxu1 }
 0x108   : > { %853 = vst.msk [vmem:[%s1408_s4 + $0xc8] sm:$0xff] %vm827_vm1, %v634_v40  ;;  %885 = vst.msk [vmem:[%s1408_s4 + $0x1c8] sm:$0xff] %vm827_vm1, %v794_v41  ;;  %v629_v44 = vadd.f32 %v1401_v4, %v628_v42  ;;  %v789_v45 = vadd.f32 %v1401_v4, %v788_v43 }
 0x109   : > { %v1141_v46 = vpop.f32.mrf.mxu0  ;;  %v1189_v47 = vpop.f32.mrf.mxu1 }
 0x10a   : > { %852 = vst.msk [vmem:[%s1408_s4 + $0xc0] sm:$0xff] %vm827_vm1, %v629_v44  ;;  %884 = vst.msk [vmem:[%s1408_s4 + $0x1c0] sm:$0xff] %vm827_vm1, %v789_v45  ;;  %v644_v48 = vadd.f32 %v1141_v46, %v1401_v4  ;;  %v804_v49 = vadd.f32 %v1189_v47, %v1401_v4 }
 0x10b   : > { %v638_v50 = vpop.f32.mrf.mxu0  ;;  %v798_v51 = vpop.f32.mrf.mxu1 }
 0x10c   : > { %855 = vst.msk [vmem:[%s1408_s4 + $0xd8] sm:$0xff] %vm827_vm1, %v644_v48  ;;  %887 = vst.msk [vmem:[%s1408_s4 + $0x1d8] sm:$0xff] %vm827_vm1, %v804_v49  ;;  %v639_v52 = vadd.f32 %v1401_v4, %v638_v50  ;;  %v799_v53 = vadd.f32 %v1401_v4, %v798_v51 }
 0x10d   : > { %v1144_v54 = vpop.f32.mrf.mxu0  ;;  %v1192_v55 = vpop.f32.mrf.mxu1 }
 0x10e   : > { %854 = vst.msk [vmem:[%s1408_s4 + $0xd0] sm:$0xff] %vm827_vm1, %v639_v52  ;;  %886 = vst.msk [vmem:[%s1408_s4 + $0x1d0] sm:$0xff] %vm827_vm1, %v799_v53  ;;  %v654_v56 = vadd.f32 %v1144_v54, %v1401_v4  ;;  %v814_v57 = vadd.f32 %v1192_v55, %v1401_v4 }
 0x10f   : > { %v648_v58 = vpop.f32.mrf.mxu0  ;;  %v808_v59 = vpop.f32.mrf.mxu1 }
 0x110   : > { %857 = vst.msk [vmem:[%s1408_s4 + $0xe8] sm:$0xff] %vm827_vm1, %v654_v56  ;;  %889 = vst.msk [vmem:[%s1408_s4 + $0x1e8] sm:$0xff] %vm827_vm1, %v814_v57  ;;  %v649_v60 = vadd.f32 %v1401_v4, %v648_v58  ;;  %v809_v61 = vadd.f32 %v1401_v4, %v808_v59 }
 0x111   : > { %v1147_v62 = vpop.f32.mrf.mxu0  ;;  %v1195_v63 = vpop.f32.mrf.mxu1 }
 0x112   : > { %856 = vst.msk [vmem:[%s1408_s4 + $0xe0] sm:$0xff] %vm827_vm1, %v649_v60  ;;  %888 = vst.msk [vmem:[%s1408_s4 + $0x1e0] sm:$0xff] %vm827_vm1, %v809_v61  ;;  %v664_v0 = vadd.f32 %v1147_v62, %v1401_v4  ;;  %v824_v1 = vadd.f32 %v1195_v63, %v1401_v4 }
 0x113   : > { %v658_v2 = vpop.f32.mrf.mxu0  ;;  %v818_v3 = vpop.f32.mrf.mxu1 }
 0x114   : > { %859 = vst.msk [vmem:[%s1408_s4 + $0xf8] sm:$0xff] %vm827_vm1, %v664_v0  ;;  %891 = vst.msk [vmem:[%s1408_s4 + $0x1f8] sm:$0xff] %vm827_vm1, %v824_v1  ;;  %v659_v5 = vadd.f32 %v1401_v4, %v658_v2  ;;  %v819_v6 = vadd.f32 %v1401_v4, %v818_v3 }
 0x116   : > { %858 = vst.msk [vmem:[%s1408_s4 + $0xf0] sm:$0xff] %vm827_vm1, %v659_v5  ;;  %890 = vst.msk [vmem:[%s1408_s4 + $0x1f0] sm:$0xff] %vm827_vm1, %v819_v6 }
 0x117 PF: > { %s13_s12 = sadd.s32 1, %s1218_s12  }
 0x118   : > { %p10_p4 = scmp.ge.s32.totalorder %s13_s12, 6  }
 0x11a   :  { %12 = sbr.rel (!%p10_p4) target bundleno = 1 (0x1), region = 62 }

</bundles_post_ra>
